<compile_context>
chip_gen: v5e
topology: v5e:2x2
jax: 0.10.0
libtpu: 0.0.40
codegen_flags: <defaults>
</compile_context>

<pallas_src>
import functools

import jax
import jax.numpy as jnp
from jax import lax
from jax.experimental import pallas as pl
from jax.experimental.pallas import tpu as pltpu

SMOOTH = 1e-5  # hard-coded smooth inside DiceLoss.forward


def _joint_loss_kernel(pred_ref, gt_ref, inter_ref, z_ref, y_ref, ce_ref, *,
                       C, ts, hw, n_tiles, splits, tiles_per_split, needs_mask):
    p = pl.program_id(0)
    i = pl.program_id(1)

    @pl.when(i == 0)
    def _():
        inter_ref[...] = jnp.zeros_like(inter_ref)
        z_ref[...] = jnp.zeros_like(z_ref)
        y_ref[...] = jnp.zeros_like(y_ref)
        ce_ref[...] = jnp.zeros_like(ce_ref)

    # per-class (ts, 128) slabs — full sublane/lane occupancy
    logits = [pred_ref[0, c].astype(jnp.float32) for c in range(C)]
    gt = gt_ref[0, 0]

    # softmax over classes == elementwise ops across the C slabs
    m = logits[0]
    for c in range(1, C):
        m = jnp.maximum(m, logits[c])
    exps = [jnp.exp(logits[c] - m) for c in range(C)]
    denom = exps[0]
    for c in range(1, C):
        denom = denom + exps[c]
    inv = pl.reciprocal(denom, approx=False)       # exact; EUP slot, negligible cost
    sm = [exps[c] * inv for c in range(C)]

    # one-hot labels via per-class compares (no full-size iota)
    labels = [(gt == c).astype(jnp.float32) for c in range(C)]

    # per-pixel cross entropy:  logsumexp(logits) - logits[gt]
    picked = labels[0] * logits[0]
    for c in range(1, C):
        picked = picked + labels[c] * logits[c]
    ce_px = (jnp.log(denom) + m) - picked

    def fold(v):                                   # (ts, 128) -> (8, 128)
        return jnp.sum(v.reshape(ts // 8, 8, 128), axis=0)

    def accumulate(mask):
        mk = (lambda v: v) if mask is None else (lambda v: jnp.where(mask, v, 0.0))
        for c in range(C):
            s = mk(sm[c])
            lab = mk(labels[c])
            inter_ref[0, c] += fold(s * lab)
            z_ref[0, c] += fold(s)
            y_ref[0, c] += fold(lab)
        ce_ref[0, 0] += fold(mk(ce_px))

    if needs_mask:
        if splits == 1:
            global_tile = i
        else:
            global_tile = (p % splits) * tiles_per_split + i
        is_tail = global_tile == (n_tiles - 1)

        @pl.when(is_tail)
        def _():
            rows = lax.broadcasted_iota(jnp.int32, (ts, 128), 0)
            lanes = lax.broadcasted_iota(jnp.int32, (ts, 128), 1)
            pix = (global_tile * ts + rows) * 128 + lanes
            accumulate(pix < hw)

        @pl.when(jnp.logical_not(is_tail))
        def _():
            accumulate(None)
    else:
        accumulate(None)


def joint_loss(pred, gt, *, ts=512):
    """pred: (B, C, H, W) float logits (f32/bf16); gt: (B, 1, H, W) ints in [0, C)."""
    B, C, H, W = pred.shape
    hw = H * W

    n128 = pl.cdiv(hw, 128)            # pixel rows of 128 lanes
    n128 = max(n128, 8)                # keep the row axis at least one (8, 128) tile
    hw_pad = n128 * 128

    # row tile: ts rows of 128 pixels; multiple of 8, never wider than the row axis
    ts = max(8, (min(ts, n128) // 8) * 8)
    n_tiles = pl.cdiv(n128, ts)
    needs_mask = n_tiles * ts * 128 != hw

    pred_r = pred.reshape(B, C, hw)
    gt_r = gt.reshape(B, 1, hw)        # keep gt's narrow dtype; no wrapper astype
    if hw_pad != hw:
        # TODO(synk): this pad is a full-tensor HBM copy; it only triggers when H*W is
        # not a multiple of 128 (the lane-major 4-D view needs it).
        pad = hw_pad - hw
        pred_r = jnp.pad(pred_r, ((0, 0), (0, 0), (0, pad)))
        gt_r = jnp.pad(gt_r, ((0, 0), (0, 0), (0, pad)))
    pred_r = pred_r.reshape(B, C, n128, 128)
    gt_r = gt_r.reshape(B, 1, n128, 128)

    # v7x: give both TensorCores work when B == 1 by splitting the tile axis in two
    splits = 2 if (B == 1 and n_tiles % 2 == 0) else 1
    tiles_per_split = n_tiles // splits
    n_par = B * splits

    if splits == 1:
        def in_idx(p, i):
            return (p, 0, i, 0)
    else:
        def in_idx(p, i):
            return (p // splits, 0, (p % splits) * tiles_per_split + i, 0)

    def out_idx(p, i):
        return (p, 0, 0, 0)

    kernel = functools.partial(
        _joint_loss_kernel, C=C, ts=ts, hw=hw, n_tiles=n_tiles,
        splits=splits, tiles_per_split=tiles_per_split, needs_mask=needs_mask)

    # Default double-buffering is enough: per-step blocks are small vs VMEM on all
    # generations; only add pl.Buffered(3) if a trace shows exposed DMA.
    inter, z, y, ce = pl.pallas_call(
        kernel,
        out_shape=(
            jax.ShapeDtypeStruct((n_par, C, 8, 128), jnp.float32),   # dice intersect
            jax.ShapeDtypeStruct((n_par, C, 8, 128), jnp.float32),   # dice z_sum
            jax.ShapeDtypeStruct((n_par, C, 8, 128), jnp.float32),   # dice y_sum
            jax.ShapeDtypeStruct((n_par, 1, 8, 128), jnp.float32),   # CE numerator
        ),
        grid=(n_par, tiles_per_split),
        in_specs=[
            pl.BlockSpec((1, C, ts, 128), in_idx),
            pl.BlockSpec((1, 1, ts, 128), in_idx),
        ],
        out_specs=(
            pl.BlockSpec((1, C, 8, 128), out_idx),
            pl.BlockSpec((1, C, 8, 128), out_idx),
            pl.BlockSpec((1, C, 8, 128), out_idx),
            pl.BlockSpec((1, 1, 8, 128), out_idx),
        ),
        compiler_params=pltpu.CompilerParams(
            dimension_semantics=("parallel", "arbitrary")),
    )(pred_r, gt_r)

    # tiny final fold in plain JAX
    inter_c = jnp.sum(inter, axis=(0, 2, 3))      # (C,)
    z_c = jnp.sum(z, axis=(0, 2, 3))              # (C,)
    y_c = jnp.sum(y, axis=(0, 2, 3))              # (C,)
    dice_sum = jnp.sum((2.0 * inter_c + SMOOTH) / (z_c + y_c + SMOOTH))
    dice_loss = 1.0 - dice_sum / float(C)
    ce_mean = jnp.sum(ce) / float(B * hw)
    return (ce_mean + dice_loss) / 2.0


def _reference(pred, gt):
    """Pure-JAX mirror of JointLoss.forward for verification."""
    B, C, H, W = pred.shape
    logits = pred.astype(jnp.float32)
    gt_s = gt.reshape(B, H, W)
    onehot = jax.nn.one_hot(gt_s, C, axis=1, dtype=jnp.float32)       # (B, C, H, W)
    lse = jax.scipy.special.logsumexp(logits, axis=1)                 # (B, H, W)
    picked = jnp.sum(onehot * logits, axis=1)                         # (B, H, W)
    ce = jnp.mean(lse - picked)
    sm = jax.nn.softmax(logits, axis=1)
    dice = 0.0
    for c in range(C):
        inter = jnp.sum(sm[:, c] * onehot[:, c])
        zs = jnp.sum(sm[:, c])
        ys = jnp.sum(onehot[:, c])
        dice = dice + (2.0 * inter + SMOOTH) / (zs + ys + SMOOTH)
    dice_loss = 1.0 - dice / C
    return (ce + dice_loss) / 2.0


if __name__ == "__main__":
    key = jax.random.PRNGKey(0)
    k_pred, k_gt = jax.random.split(key)

    C = 3  # DiceLoss.forward hard-codes labels 0/1/2 (one-hot for 3 classes)

    # case 1: 128-aligned pixel count (hw = 1024), one tile per batch element
    B, H, W = 2, 32, 32
    pred = jax.random.normal(k_pred, (B, C, H, W), dtype=jnp.float32)
    gt = jax.random.randint(k_gt, (B, 1, H, W), 0, C, dtype=jnp.int32)
    loss = jax.block_until_ready(joint_loss(pred, gt))
    ref = _reference(pred, gt)
    assert abs(float(loss) - float(ref)) < 3e-3, (float(loss), float(ref))

    # case 2: ragged hw (40*40 = 1600): 128-pad + multi-tile + last-tile masking
    B2, H2, W2 = 2, 40, 40
    pred2 = jax.random.normal(k_pred, (B2, C, H2, W2), dtype=jnp.float32)
    gt2 = jax.random.randint(k_gt, (B2, 1, H2, W2), 0, C, dtype=jnp.int32)
    loss2 = jax.block_until_ready(joint_loss(pred2, gt2))
    ref2 = _reference(pred2, gt2)
    assert abs(float(loss2) - float(ref2)) < 3e-3, (float(loss2), float(ref2))

    # case 3: B == 1, bf16 logits -> tile axis split across the parallel grid axis (v7x)
    B3, H3, W3 = 1, 128, 128
    pred3 = jax.random.normal(k_pred, (B3, C, H3, W3), dtype=jnp.bfloat16)
    gt3 = jax.random.randint(k_gt, (B3, 1, H3, W3), 0, C, dtype=jnp.int32)
    loss3 = jax.block_until_ready(joint_loss(pred3, gt3, ts=64))
    ref3 = _reference(pred3, gt3)
    assert abs(float(loss3) - float(ref3)) < 3e-3, (float(loss3), float(ref3))

    print("KERNEL_OK")
</pallas_src>

<mosaic_0001>
module attributes {stable_mosaic.version = 11 : i64} {
  func.func @_joint_loss_kernel(%arg0: i32, %arg1: i32, %arg2: memref<1x3x8x128xf32, #tpu.memory_space<vmem>>, %arg3: memref<1x1x8x128xi32, #tpu.memory_space<vmem>>, %arg4: memref<1x3x8x128xf32, #tpu.memory_space<vmem>>, %arg5: memref<1x3x8x128xf32, #tpu.memory_space<vmem>>, %arg6: memref<1x3x8x128xf32, #tpu.memory_space<vmem>>, %arg7: memref<1x1x8x128xf32, #tpu.memory_space<vmem>>) attributes {dimension_semantics = [#tpu.dimension_semantics<parallel>, #tpu.dimension_semantics<arbitrary>], iteration_bounds = array<i64: 2, 1>, scalar_prefetch = 0 : i64, scratch_operands = 0 : i64, tpu.core_type = #tpu.core_type<tc>, window_params = [{transform_indices = @transform_0, window_bounds = array<i64: 1, 3, 8, 128>}, {transform_indices = @transform_1, window_bounds = array<i64: 1, 1, 8, 128>}, {transform_indices = @transform_2, window_bounds = array<i64: 1, 3, 8, 128>}, {transform_indices = @transform_3, window_bounds = array<i64: 1, 3, 8, 128>}, {transform_indices = @transform_4, window_bounds = array<i64: 1, 3, 8, 128>}, {transform_indices = @transform_5, window_bounds = array<i64: 1, 1, 8, 128>}]} {
    %c0_i32 = arith.constant 0 : i32
    %0 = arith.cmpi eq, %arg1, %c0_i32 : i32
    %1 = arith.extui %0 : i1 to i32
    %c0_i32_0 = arith.constant 0 : i32
    %2 = arith.cmpi ne, %1, %c0_i32_0 : i32
    scf.if %2 {
      %cst_104 = arith.constant 0.000000e+00 : f32
      %128 = vector.broadcast %cst_104 : f32 to vector<1x3x8x128xf32>
      %c0_105 = arith.constant 0 : index
      %c0_106 = arith.constant 0 : index
      %c0_107 = arith.constant 0 : index
      %c0_108 = arith.constant 0 : index
      %129 = vector.load %arg4[%c0_105, %c0_106, %c0_107, %c0_108] : memref<1x3x8x128xf32, #tpu.memory_space<vmem>>, vector<1x3x8x128xf32>
      tpu.vector_store %arg4[%c0_105, %c0_106, %c0_107, %c0_108], %128 {strides = array<i32>} : memref<1x3x8x128xf32, #tpu.memory_space<vmem>>, vector<1x3x8x128xf32>,
      %cst_109 = arith.constant 0.000000e+00 : f32
      %130 = vector.broadcast %cst_109 : f32 to vector<1x3x8x128xf32>
      %c0_110 = arith.constant 0 : index
      %c0_111 = arith.constant 0 : index
      %c0_112 = arith.constant 0 : index
      %c0_113 = arith.constant 0 : index
      %131 = vector.load %arg5[%c0_110, %c0_111, %c0_112, %c0_113] : memref<1x3x8x128xf32, #tpu.memory_space<vmem>>, vector<1x3x8x128xf32>
      tpu.vector_store %arg5[%c0_110, %c0_111, %c0_112, %c0_113], %130 {strides = array<i32>} : memref<1x3x8x128xf32, #tpu.memory_space<vmem>>, vector<1x3x8x128xf32>,
      %cst_114 = arith.constant 0.000000e+00 : f32
      %132 = vector.broadcast %cst_114 : f32 to vector<1x3x8x128xf32>
      %c0_115 = arith.constant 0 : index
      %c0_116 = arith.constant 0 : index
      %c0_117 = arith.constant 0 : index
      %c0_118 = arith.constant 0 : index
      %133 = vector.load %arg6[%c0_115, %c0_116, %c0_117, %c0_118] : memref<1x3x8x128xf32, #tpu.memory_space<vmem>>, vector<1x3x8x128xf32>
      tpu.vector_store %arg6[%c0_115, %c0_116, %c0_117, %c0_118], %132 {strides = array<i32>} : memref<1x3x8x128xf32, #tpu.memory_space<vmem>>, vector<1x3x8x128xf32>,
      %cst_119 = arith.constant 0.000000e+00 : f32
      %134 = vector.broadcast %cst_119 : f32 to vector<1x1x8x128xf32>
      %c0_120 = arith.constant 0 : index
      %c0_121 = arith.constant 0 : index
      %c0_122 = arith.constant 0 : index
      %c0_123 = arith.constant 0 : index
      %135 = vector.load %arg7[%c0_120, %c0_121, %c0_122, %c0_123] : memref<1x1x8x128xf32, #tpu.memory_space<vmem>>, vector<1x1x8x128xf32>
      tpu.vector_store %arg7[%c0_120, %c0_121, %c0_122, %c0_123], %134 {strides = array<i32>} : memref<1x1x8x128xf32, #tpu.memory_space<vmem>>, vector<1x1x8x128xf32>,
    } else {
    }
    %c0 = arith.constant 0 : index
    %c0_1 = arith.constant 0 : index
    %c0_2 = arith.constant 0 : index
    %c0_3 = arith.constant 0 : index
    %3 = vector.load %arg2[%c0, %c0_1, %c0_2, %c0_3] : memref<1x3x8x128xf32, #tpu.memory_space<vmem>>, vector<1x1x8x128xf32>
    %4 = vector.shape_cast %3 : vector<1x1x8x128xf32> to vector<8x128xf32>
    %c0_4 = arith.constant 0 : index
    %c1 = arith.constant 1 : index
    %c0_5 = arith.constant 0 : index
    %c0_6 = arith.constant 0 : index
    %5 = vector.load %arg2[%c0_4, %c1, %c0_5, %c0_6] : memref<1x3x8x128xf32, #tpu.memory_space<vmem>>, vector<1x1x8x128xf32>
    %6 = vector.shape_cast %5 : vector<1x1x8x128xf32> to vector<8x128xf32>
    %c0_7 = arith.constant 0 : index
    %c2 = arith.constant 2 : index
    %c0_8 = arith.constant 0 : index
    %c0_9 = arith.constant 0 : index
    %7 = vector.load %arg2[%c0_7, %c2, %c0_8, %c0_9] : memref<1x3x8x128xf32, #tpu.memory_space<vmem>>, vector<1x1x8x128xf32>
    %8 = vector.shape_cast %7 : vector<1x1x8x128xf32> to vector<8x128xf32>
    %c0_10 = arith.constant 0 : index
    %c0_11 = arith.constant 0 : index
    %c0_12 = arith.constant 0 : index
    %c0_13 = arith.constant 0 : index
    %9 = vector.load %arg3[%c0_10, %c0_11, %c0_12, %c0_13] : memref<1x1x8x128xi32, #tpu.memory_space<vmem>>, vector<1x1x8x128xi32>
    %10 = vector.shape_cast %9 : vector<1x1x8x128xi32> to vector<8x128xi32>
    %11 = arith.maximumf %4, %6 : vector<8x128xf32>
    %12 = arith.maximumf %11, %8 : vector<8x128xf32>
    %13 = arith.subf %4, %12 : vector<8x128xf32>
    %14 = math.exp %13 : vector<8x128xf32>
    %15 = arith.subf %6, %12 : vector<8x128xf32>
    %16 = math.exp %15 : vector<8x128xf32>
    %17 = arith.subf %8, %12 : vector<8x128xf32>
    %18 = math.exp %17 : vector<8x128xf32>
    %19 = arith.addf %14, %16 : vector<8x128xf32>
    %20 = arith.addf %19, %18 : vector<8x128xf32>
    %21 = tpu.reciprocal %20 : vector<8x128xf32> -> vector<8x128xf32>
    %22 = arith.mulf %14, %21 : vector<8x128xf32>
    %23 = arith.mulf %16, %21 : vector<8x128xf32>
    %24 = arith.mulf %18, %21 : vector<8x128xf32>
    %c0_i32_14 = arith.constant 0 : i32
    %25 = vector.broadcast %c0_i32_14 : i32 to vector<8x128xi32>
    %26 = arith.cmpi eq, %10, %25 : vector<8x128xi32>
    %27 = arith.extui %26 : vector<8x128xi1> to vector<8x128xi32>
    %28 = arith.sitofp %27 : vector<8x128xi32> to vector<8x128xf32>
    %c1_i32 = arith.constant 1 : i32
    %29 = vector.broadcast %c1_i32 : i32 to vector<8x128xi32>
    %30 = arith.cmpi eq, %10, %29 : vector<8x128xi32>
    %31 = arith.extui %30 : vector<8x128xi1> to vector<8x128xi32>
    %32 = arith.sitofp %31 : vector<8x128xi32> to vector<8x128xf32>
    %c2_i32 = arith.constant 2 : i32
    %33 = vector.broadcast %c2_i32 : i32 to vector<8x128xi32>
    %34 = arith.cmpi eq, %10, %33 : vector<8x128xi32>
    %35 = arith.extui %34 : vector<8x128xi1> to vector<8x128xi32>
    %36 = arith.sitofp %35 : vector<8x128xi32> to vector<8x128xf32>
    %37 = arith.mulf %28, %4 : vector<8x128xf32>
    %38 = arith.mulf %32, %6 : vector<8x128xf32>
    %39 = arith.addf %37, %38 : vector<8x128xf32>
    %40 = arith.mulf %36, %8 : vector<8x128xf32>
    %41 = arith.addf %39, %40 : vector<8x128xf32>
    %42 = math.log %20 : vector<8x128xf32>
    %43 = arith.addf %42, %12 : vector<8x128xf32>
    %44 = arith.subf %43, %41 : vector<8x128xf32>
    %c0_15 = arith.constant 0 : index
    %c0_16 = arith.constant 0 : index
    %c0_17 = arith.constant 0 : index
    %c0_18 = arith.constant 0 : index
    %45 = vector.load %arg4[%c0_15, %c0_16, %c0_17, %c0_18] : memref<1x3x8x128xf32, #tpu.memory_space<vmem>>, vector<1x1x8x128xf32>
    %46 = vector.shape_cast %45 : vector<1x1x8x128xf32> to vector<8x128xf32>
    %47 = arith.mulf %22, %28 : vector<8x128xf32>
    %48 = vector.shape_cast %47 : vector<8x128xf32> to vector<1x8x128xf32>
    %cst = arith.constant dense<0.000000e+00> : vector<8x128xf32>
    %49 = vector.multi_reduction <add>, %48, %cst [0] : vector<1x8x128xf32> to vector<8x128xf32>
    %50 = arith.addf %46, %49 : vector<8x128xf32>
    %c0_19 = arith.constant 0 : index
    %c0_20 = arith.constant 0 : index
    %c0_21 = arith.constant 0 : index
    %c0_22 = arith.constant 0 : index
    %51 = vector.load %arg4[%c0_19, %c0_20, %c0_21, %c0_22] : memref<1x3x8x128xf32, #tpu.memory_space<vmem>>, vector<1x1x8x128xf32>
    %52 = vector.shape_cast %51 : vector<1x1x8x128xf32> to vector<8x128xf32>
    %53 = vector.shape_cast %50 : vector<8x128xf32> to vector<1x1x8x128xf32>
    tpu.vector_store %arg4[%c0_19, %c0_20, %c0_21, %c0_22], %53 {strides = array<i32>} : memref<1x3x8x128xf32, #tpu.memory_space<vmem>>, vector<1x1x8x128xf32>,
    %c0_23 = arith.constant 0 : index
    %c0_24 = arith.constant 0 : index
    %c0_25 = arith.constant 0 : index
    %c0_26 = arith.constant 0 : index
    %54 = vector.load %arg5[%c0_23, %c0_24, %c0_25, %c0_26] : memref<1x3x8x128xf32, #tpu.memory_space<vmem>>, vector<1x1x8x128xf32>
    %55 = vector.shape_cast %54 : vector<1x1x8x128xf32> to vector<8x128xf32>
    %56 = vector.shape_cast %22 : vector<8x128xf32> to vector<1x8x128xf32>
    %cst_27 = arith.constant dense<0.000000e+00> : vector<8x128xf32>
    %57 = vector.multi_reduction <add>, %56, %cst_27 [0] : vector<1x8x128xf32> to vector<8x128xf32>
    %58 = arith.addf %55, %57 : vector<8x128xf32>
    %c0_28 = arith.constant 0 : index
    %c0_29 = arith.constant 0 : index
    %c0_30 = arith.constant 0 : index
    %c0_31 = arith.constant 0 : index
    %59 = vector.load %arg5[%c0_28, %c0_29, %c0_30, %c0_31] : memref<1x3x8x128xf32, #tpu.memory_space<vmem>>, vector<1x1x8x128xf32>
    %60 = vector.shape_cast %59 : vector<1x1x8x128xf32> to vector<8x128xf32>
    %61 = vector.shape_cast %58 : vector<8x128xf32> to vector<1x1x8x128xf32>
    tpu.vector_store %arg5[%c0_28, %c0_29, %c0_30, %c0_31], %61 {strides = array<i32>} : memref<1x3x8x128xf32, #tpu.memory_space<vmem>>, vector<1x1x8x128xf32>,
    %c0_32 = arith.constant 0 : index
    %c0_33 = arith.constant 0 : index
    %c0_34 = arith.constant 0 : index
    %c0_35 = arith.constant 0 : index
    %62 = vector.load %arg6[%c0_32, %c0_33, %c0_34, %c0_35] : memref<1x3x8x128xf32, #tpu.memory_space<vmem>>, vector<1x1x8x128xf32>
    %63 = vector.shape_cast %62 : vector<1x1x8x128xf32> to vector<8x128xf32>
    %64 = vector.shape_cast %28 : vector<8x128xf32> to vector<1x8x128xf32>
    %cst_36 = arith.constant dense<0.000000e+00> : vector<8x128xf32>
    %65 = vector.multi_reduction <add>, %64, %cst_36 [0] : vector<1x8x128xf32> to vector<8x128xf32>
    %66 = arith.addf %63, %65 : vector<8x128xf32>
    %c0_37 = arith.constant 0 : index
    %c0_38 = arith.constant 0 : index
    %c0_39 = arith.constant 0 : index
    %c0_40 = arith.constant 0 : index
    %67 = vector.load %arg6[%c0_37, %c0_38, %c0_39, %c0_40] : memref<1x3x8x128xf32, #tpu.memory_space<vmem>>, vector<1x1x8x128xf32>
    %68 = vector.shape_cast %67 : vector<1x1x8x128xf32> to vector<8x128xf32>
    %69 = vector.shape_cast %66 : vector<8x128xf32> to vector<1x1x8x128xf32>
    tpu.vector_store %arg6[%c0_37, %c0_38, %c0_39, %c0_40], %69 {strides = array<i32>} : memref<1x3x8x128xf32, #tpu.memory_space<vmem>>, vector<1x1x8x128xf32>,
    %c0_41 = arith.constant 0 : index
    %c1_42 = arith.constant 1 : index
    %c0_43 = arith.constant 0 : index
    %c0_44 = arith.constant 0 : index
    %70 = vector.load %arg4[%c0_41, %c1_42, %c0_43, %c0_44] : memref<1x3x8x128xf32, #tpu.memory_space<vmem>>, vector<1x1x8x128xf32>
    %71 = vector.shape_cast %70 : vector<1x1x8x128xf32> to vector<8x128xf32>
    %72 = arith.mulf %23, %32 : vector<8x128xf32>
    %73 = vector.shape_cast %72 : vector<8x128xf32> to vector<1x8x128xf32>
    %cst_45 = arith.constant dense<0.000000e+00> : vector<8x128xf32>
    %74 = vector.multi_reduction <add>, %73, %cst_45 [0] : vector<1x8x128xf32> to vector<8x128xf32>
    %75 = arith.addf %71, %74 : vector<8x128xf32>
    %c0_46 = arith.constant 0 : index
    %c1_47 = arith.constant 1 : index
    %c0_48 = arith.constant 0 : index
    %c0_49 = arith.constant 0 : index
    %76 = vector.load %arg4[%c0_46, %c1_47, %c0_48, %c0_49] : memref<1x3x8x128xf32, #tpu.memory_space<vmem>>, vector<1x1x8x128xf32>
    %77 = vector.shape_cast %76 : vector<1x1x8x128xf32> to vector<8x128xf32>
    %78 = vector.shape_cast %75 : vector<8x128xf32> to vector<1x1x8x128xf32>
    tpu.vector_store %arg4[%c0_46, %c1_47, %c0_48, %c0_49], %78 {strides = array<i32>} : memref<1x3x8x128xf32, #tpu.memory_space<vmem>>, vector<1x1x8x128xf32>,
    %c0_50 = arith.constant 0 : index
    %c1_51 = arith.constant 1 : index
    %c0_52 = arith.constant 0 : index
    %c0_53 = arith.constant 0 : index
    %79 = vector.load %arg5[%c0_50, %c1_51, %c0_52, %c0_53] : memref<1x3x8x128xf32, #tpu.memory_space<vmem>>, vector<1x1x8x128xf32>
    %80 = vector.shape_cast %79 : vector<1x1x8x128xf32> to vector<8x128xf32>
    %81 = vector.shape_cast %23 : vector<8x128xf32> to vector<1x8x128xf32>
    %cst_54 = arith.constant dense<0.000000e+00> : vector<8x128xf32>
    %82 = vector.multi_reduction <add>, %81, %cst_54 [0] : vector<1x8x128xf32> to vector<8x128xf32>
    %83 = arith.addf %80, %82 : vector<8x128xf32>
    %c0_55 = arith.constant 0 : index
    %c1_56 = arith.constant 1 : index
    %c0_57 = arith.constant 0 : index
    %c0_58 = arith.constant 0 : index
    %84 = vector.load %arg5[%c0_55, %c1_56, %c0_57, %c0_58] : memref<1x3x8x128xf32, #tpu.memory_space<vmem>>, vector<1x1x8x128xf32>
    %85 = vector.shape_cast %84 : vector<1x1x8x128xf32> to vector<8x128xf32>
    %86 = vector.shape_cast %83 : vector<8x128xf32> to vector<1x1x8x128xf32>
    tpu.vector_store %arg5[%c0_55, %c1_56, %c0_57, %c0_58], %86 {strides = array<i32>} : memref<1x3x8x128xf32, #tpu.memory_space<vmem>>, vector<1x1x8x128xf32>,
    %c0_59 = arith.constant 0 : index
    %c1_60 = arith.constant 1 : index
    %c0_61 = arith.constant 0 : index
    %c0_62 = arith.constant 0 : index
    %87 = vector.load %arg6[%c0_59, %c1_60, %c0_61, %c0_62] : memref<1x3x8x128xf32, #tpu.memory_space<vmem>>, vector<1x1x8x128xf32>
    %88 = vector.shape_cast %87 : vector<1x1x8x128xf32> to vector<8x128xf32>
    %89 = vector.shape_cast %32 : vector<8x128xf32> to vector<1x8x128xf32>
    %cst_63 = arith.constant dense<0.000000e+00> : vector<8x128xf32>
    %90 = vector.multi_reduction <add>, %89, %cst_63 [0] : vector<1x8x128xf32> to vector<8x128xf32>
    %91 = arith.addf %88, %90 : vector<8x128xf32>
    %c0_64 = arith.constant 0 : index
    %c1_65 = arith.constant 1 : index
    %c0_66 = arith.constant 0 : index
    %c0_67 = arith.constant 0 : index
    %92 = vector.load %arg6[%c0_64, %c1_65, %c0_66, %c0_67] : memref<1x3x8x128xf32, #tpu.memory_space<vmem>>, vector<1x1x8x128xf32>
    %93 = vector.shape_cast %92 : vector<1x1x8x128xf32> to vector<8x128xf32>
    %94 = vector.shape_cast %91 : vector<8x128xf32> to vector<1x1x8x128xf32>
    tpu.vector_store %arg6[%c0_64, %c1_65, %c0_66, %c0_67], %94 {strides = array<i32>} : memref<1x3x8x128xf32, #tpu.memory_space<vmem>>, vector<1x1x8x128xf32>,
    %c0_68 = arith.constant 0 : index
    %c2_69 = arith.constant 2 : index
    %c0_70 = arith.constant 0 : index
    %c0_71 = arith.constant 0 : index
    %95 = vector.load %arg4[%c0_68, %c2_69, %c0_70, %c0_71] : memref<1x3x8x128xf32, #tpu.memory_space<vmem>>, vector<1x1x8x128xf32>
    %96 = vector.shape_cast %95 : vector<1x1x8x128xf32> to vector<8x128xf32>
    %97 = arith.mulf %24, %36 : vector<8x128xf32>
    %98 = vector.shape_cast %97 : vector<8x128xf32> to vector<1x8x128xf32>
    %cst_72 = arith.constant dense<0.000000e+00> : vector<8x128xf32>
    %99 = vector.multi_reduction <add>, %98, %cst_72 [0] : vector<1x8x128xf32> to vector<8x128xf32>
    %100 = arith.addf %96, %99 : vector<8x128xf32>
    %c0_73 = arith.constant 0 : index
    %c2_74 = arith.constant 2 : index
    %c0_75 = arith.constant 0 : index
    %c0_76 = arith.constant 0 : index
    %101 = vector.load %arg4[%c0_73, %c2_74, %c0_75, %c0_76] : memref<1x3x8x128xf32, #tpu.memory_space<vmem>>, vector<1x1x8x128xf32>
    %102 = vector.shape_cast %101 : vector<1x1x8x128xf32> to vector<8x128xf32>
    %103 = vector.shape_cast %100 : vector<8x128xf32> to vector<1x1x8x128xf32>
    tpu.vector_store %arg4[%c0_73, %c2_74, %c0_75, %c0_76], %103 {strides = array<i32>} : memref<1x3x8x128xf32, #tpu.memory_space<vmem>>, vector<1x1x8x128xf32>,
    %c0_77 = arith.constant 0 : index
    %c2_78 = arith.constant 2 : index
    %c0_79 = arith.constant 0 : index
    %c0_80 = arith.constant 0 : index
    %104 = vector.load %arg5[%c0_77, %c2_78, %c0_79, %c0_80] : memref<1x3x8x128xf32, #tpu.memory_space<vmem>>, vector<1x1x8x128xf32>
    %105 = vector.shape_cast %104 : vector<1x1x8x128xf32> to vector<8x128xf32>
    %106 = vector.shape_cast %24 : vector<8x128xf32> to vector<1x8x128xf32>
    %cst_81 = arith.constant dense<0.000000e+00> : vector<8x128xf32>
    %107 = vector.multi_reduction <add>, %106, %cst_81 [0] : vector<1x8x128xf32> to vector<8x128xf32>
    %108 = arith.addf %105, %107 : vector<8x128xf32>
    %c0_82 = arith.constant 0 : index
    %c2_83 = arith.constant 2 : index
    %c0_84 = arith.constant 0 : index
    %c0_85 = arith.constant 0 : index
    %109 = vector.load %arg5[%c0_82, %c2_83, %c0_84, %c0_85] : memref<1x3x8x128xf32, #tpu.memory_space<vmem>>, vector<1x1x8x128xf32>
    %110 = vector.shape_cast %109 : vector<1x1x8x128xf32> to vector<8x128xf32>
    %111 = vector.shape_cast %108 : vector<8x128xf32> to vector<1x1x8x128xf32>
    tpu.vector_store %arg5[%c0_82, %c2_83, %c0_84, %c0_85], %111 {strides = array<i32>} : memref<1x3x8x128xf32, #tpu.memory_space<vmem>>, vector<1x1x8x128xf32>,
    %c0_86 = arith.constant 0 : index
    %c2_87 = arith.constant 2 : index
    %c0_88 = arith.constant 0 : index
    %c0_89 = arith.constant 0 : index
    %112 = vector.load %arg6[%c0_86, %c2_87, %c0_88, %c0_89] : memref<1x3x8x128xf32, #tpu.memory_space<vmem>>, vector<1x1x8x128xf32>
    %113 = vector.shape_cast %112 : vector<1x1x8x128xf32> to vector<8x128xf32>
    %114 = vector.shape_cast %36 : vector<8x128xf32> to vector<1x8x128xf32>
    %cst_90 = arith.constant dense<0.000000e+00> : vector<8x128xf32>
    %115 = vector.multi_reduction <add>, %114, %cst_90 [0] : vector<1x8x128xf32> to vector<8x128xf32>
    %116 = arith.addf %113, %115 : vector<8x128xf32>
    %c0_91 = arith.constant 0 : index
    %c2_92 = arith.constant 2 : index
    %c0_93 = arith.constant 0 : index
    %c0_94 = arith.constant 0 : index
    %117 = vector.load %arg6[%c0_91, %c2_92, %c0_93, %c0_94] : memref<1x3x8x128xf32, #tpu.memory_space<vmem>>, vector<1x1x8x128xf32>
    %118 = vector.shape_cast %117 : vector<1x1x8x128xf32> to vector<8x128xf32>
    %119 = vector.shape_cast %116 : vector<8x128xf32> to vector<1x1x8x128xf32>
    tpu.vector_store %arg6[%c0_91, %c2_92, %c0_93, %c0_94], %119 {strides = array<i32>} : memref<1x3x8x128xf32, #tpu.memory_space<vmem>>, vector<1x1x8x128xf32>,
    %c0_95 = arith.constant 0 : index
    %c0_96 = arith.constant 0 : index
    %c0_97 = arith.constant 0 : index
    %c0_98 = arith.constant 0 : index
    %120 = vector.load %arg7[%c0_95, %c0_96, %c0_97, %c0_98] : memref<1x1x8x128xf32, #tpu.memory_space<vmem>>, vector<1x1x8x128xf32>
    %121 = vector.shape_cast %120 : vector<1x1x8x128xf32> to vector<8x128xf32>
    %122 = vector.shape_cast %44 : vector<8x128xf32> to vector<1x8x128xf32>
    %cst_99 = arith.constant dense<0.000000e+00> : vector<8x128xf32>
    %123 = vector.multi_reduction <add>, %122, %cst_99 [0] : vector<1x8x128xf32> to vector<8x128xf32>
    %124 = arith.addf %121, %123 : vector<8x128xf32>
    %c0_100 = arith.constant 0 : index
    %c0_101 = arith.constant 0 : index
    %c0_102 = arith.constant 0 : index
    %c0_103 = arith.constant 0 : index
    %125 = vector.load %arg7[%c0_100, %c0_101, %c0_102, %c0_103] : memref<1x1x8x128xf32, #tpu.memory_space<vmem>>, vector<1x1x8x128xf32>
    %126 = vector.shape_cast %125 : vector<1x1x8x128xf32> to vector<8x128xf32>
    %127 = vector.shape_cast %124 : vector<8x128xf32> to vector<1x1x8x128xf32>
    tpu.vector_store %arg7[%c0_100, %c0_101, %c0_102, %c0_103], %127 {strides = array<i32>} : memref<1x1x8x128xf32, #tpu.memory_space<vmem>>, vector<1x1x8x128xf32>,
    return
  }
  func.func @transform_0(%arg0: i32, %arg1: i32) -> (i32, i32, i32, i32) {
    %c0_i32 = arith.constant 0 : i32
    %c0_i32_0 = arith.constant 0 : i32
    %c0_i32_1 = arith.constant 0 : i32
    return %arg0, %c0_i32, %arg1, %c0_i32_0 : i32, i32, i32, i32
  }
  func.func @transform_1(%arg0: i32, %arg1: i32) -> (i32, i32, i32, i32) {
    %c0_i32 = arith.constant 0 : i32
    %c0_i32_0 = arith.constant 0 : i32
    %c0_i32_1 = arith.constant 0 : i32
    return %arg0, %c0_i32, %arg1, %c0_i32_0 : i32, i32, i32, i32
  }
  func.func @transform_2(%arg0: i32, %arg1: i32) -> (i32, i32, i32, i32) {
    %c0_i32 = arith.constant 0 : i32
    %c0_i32_0 = arith.constant 0 : i32
    %c0_i32_1 = arith.constant 0 : i32
    %c0_i32_2 = arith.constant 0 : i32
    return %arg0, %c0_i32, %c0_i32_0, %c0_i32_1 : i32, i32, i32, i32
  }
  func.func @transform_3(%arg0: i32, %arg1: i32) -> (i32, i32, i32, i32) {
    %c0_i32 = arith.constant 0 : i32
    %c0_i32_0 = arith.constant 0 : i32
    %c0_i32_1 = arith.constant 0 : i32
    %c0_i32_2 = arith.constant 0 : i32
    return %arg0, %c0_i32, %c0_i32_0, %c0_i32_1 : i32, i32, i32, i32
  }
  func.func @transform_4(%arg0: i32, %arg1: i32) -> (i32, i32, i32, i32) {
    %c0_i32 = arith.constant 0 : i32
    %c0_i32_0 = arith.constant 0 : i32
    %c0_i32_1 = arith.constant 0 : i32
    %c0_i32_2 = arith.constant 0 : i32
    return %arg0, %c0_i32, %c0_i32_0, %c0_i32_1 : i32, i32, i32, i32
  }
  func.func @transform_5(%arg0: i32, %arg1: i32) -> (i32, i32, i32, i32) {
    %c0_i32 = arith.constant 0 : i32
    %c0_i32_0 = arith.constant 0 : i32
    %c0_i32_1 = arith.constant 0 : i32
    %c0_i32_2 = arith.constant 0 : i32
    return %arg0, %c0_i32, %c0_i32_0, %c0_i32_1 : i32, i32, i32, i32
  }
}

</mosaic_0001>

<bundles_post_ra>
// kernel: tpu_custom_call.1
= control target key start
LH: loop header
LB: loop body
LE: loop exit
PB: predicated region body
PF: predicated region fallthrough
CT: control target
= control target key end

     0   :  { %11 = vsyncpa [#allocation3], 0  ;;  %s1406_s0 = inlined_call_operand.hbm [shape: f32[2,3,8,128], index: 0, kind: input, shape index: {}]   ;;  %s1407_s1 = inlined_call_operand.hbm [shape: s32[2,1,8,128], index: 1, kind: input, shape index: {}]   ;;  %s1408_s2 = inlined_call_operand.hbm [shape: f32[2,3,8,128], index: 2, kind: output, shape index: {0}]   ;;  %s1409_s3 = inlined_call_operand.hbm [shape: f32[2,3,8,128], index: 3, kind: output, shape index: {1}]   ;;  %s1410_s4 = inlined_call_operand.hbm [shape: f32[2,3,8,128], index: 4, kind: output, shape index: {2}]   ;;  %s1411_s5 = inlined_call_operand.hbm [shape: f32[2,1,8,128], index: 5, kind: output, shape index: {3}]  }
   0x1   :  { %13 = vsyncpa [#allocation3 + $0x1], 0 }
   0x2   :  { %14 = vsyncpa [#allocation6], 0 }
   0x3   :  { %16 = vsyncpa [#allocation6 + $0x1], 0 }
   0x4   :  { %17 = vsyncpa [#allocation4], 0 }
   0x5   :  { %19 = vsyncpa [#allocation4 + $0x1], 0 }
   0x6   :  { %20 = vsyncpa [#allocation9], 0 }
   0x7   :  { %22 = vsyncpa [#allocation9 + $0x1], 0 }
   0x8   :  { %23 = vsyncpa [#allocation12], 0 }
   0x9   :  { %25 = vsyncpa [#allocation12 + $0x1], 0  ;;  %s1141_s18 = smov 0   ;;  %s1143_s19 = smov 0  }
   0xa   :  { %s1145_s20 = smov 0   ;;  %s1147_s21 = smov 0  }
   0xb   :  { %s1149_s22 = smov 0   ;;  %s1151_s23 = smov 0  }
   0xc LB: > { %1415 = sst [smem:[#allocation18_spill]] %s1092_s20  ;;  %s1172_s24 = sadd.s32 4294967295, %s1104_s23   ;;  %s1104_s23 = sphi %s1151_s23, %s31_s23   ;;  %s1100_s22 = sphi %s1149_s22, %s1430_s22   ;;  %s1096_s21 = sphi %s1147_s21, %s1429_s21   ;;  %s1092_s20 = sphi %s1145_s20, %s1425_s20   ;;  %s1088_s19 = sphi %s1143_s19, %s1428_s19   ;;  %s1084_s18 = sphi %s1141_s18, %s1427_s18  }
   0xd   : > { %s1412_s25 = sadd.s32 4294967294, %s1104_s23   ;;  %s43_s26 = sadd.s32 1, %s1100_s22 }
   0xe   : > { %s52_s27 = sadd.s32 1, %s1092_s20  ;;  %p45_p0 = scmp.ge.s32.totalorder %s43_s26, 2 }
   0xf   : > { %p59_p1 = scmp.ne.s32.totalorder %s1092_s20, %s1088_s19  ;;  %p60_p2 = scmp.eq.s32.totalorder %s1104_s23, 0 }
  0x10   : > { %p65_p3 = scmp.ne.s32.totalorder %s1088_s19, %s1084_s18  ;;  %s1432_s26 = smov (%p45_p0, %s43_s26), 0 }
  0x11   : > { %1416 = sst [smem:[#allocation19_spill]] %s1432_s26  ;;  %p1184_p4 = por %p60_p2, %p59_p1 }
  0x12   : > { %p66_p5 = scmp.eq.s32.totalorder %s1172_s24, 0  ;;  %s47_s29 = ssub.s32 %s1100_s22, %s1432_s26 }
  0x13   : > { %p117_p6 = scmp.eq.s32.totalorder %s1172_s24, 1  ;;  %p50_p7 = scmp.eq.s32.totalorder %s47_s29, 0 }
  0x14   : > { %p1192_p8 = por %p66_p5, %p65_p3  ;;  %p123_p10 = scmp.eq.s32.totalorder %s1412_s25, 1 }
  0x15   : > { %p1196_p9 = por %p117_p6, %p59_p1  ;;  %p732_p12 = scmp.ge.s32.totalorder %s1104_s23, 2 }
  0x16   : > { %s1203_s7 = scalar_select %p50_p7, %s1092_s20, %s52_s27  }
  0x17   : > { %p1205_p11 = por %p123_p10, %p65_p3  ;;  %p801_p13 = scmp.lt.s32.totalorder %s1104_s23, 2 }
  0x18   : > { %1420 = sst [smem:[#allocation20_spill]] %s1203_s7  ;;  %s221_s9 = sand.u32 1, %s1092_s20  }
  0x19   : > { %s763_s10 = smul.u32 24, %s221_s9  ;;  %p1215_p0 = pnand %p801_p13, %p1184_p4 }
  0x1a   : > { %s764_s11 = smul.u32 24, %s1100_s22  ;;  %p736_p1 = scmp.ge.s32.totalorder %s1104_s23, 1 }
  0x1b   : > { %s225_s16 = scalar_lea.vmem [#allocation2], %s763_s10  ;;  %s222_s29 = scalar_lea.sflag [#allocation3], %s221_s9 }
  0x1c   : > { %s231_s15 = scalar_lea.hbm %s1406_s0, %s764_s11  ;;  %s234_s17 = sshll.u32 %s225_s16, 4  ;;  %s235_s17 = int_to_ptr.vmem [resolvable:$true] %s234_s17 }
  0x1d   : > { %s232_s27 = sshll.u32 %s231_s15, 4  ;;  %s1106_s25 = smov 128   ;;  %s233_s27 = int_to_ptr.hbm [resolvable:$true] %s232_s27 }
  0x1e   : > { %s1107_s26 = smov 8   ;;  %p262_p2 = scmp.lt.s32.totalorder %s1104_s23, 3 }
  0x1f   : > { %784 = dma.hbm_to_vmem [thread:$0]  (!%p1215_p0), %s233_s27, 384, %s235_s17, %s222_s29, %s1106_s25, %s1106_s25, %s1107_s26  }
  0x20   : > { %s734_s28 = sshll.u32 %s221_s9, 3  ;;  %s735_s7 = sshll.u32 %s1100_s22, 3 }
  0x21   : > { %p263_p3 = pnand %p736_p1, %p262_p2  ;;  %s253_s11 = scalar_lea.hbm %s1407_s1, %s735_s7 }
  0x22   : > { %s248_s10 = scalar_lea.vmem [#allocation5], %s734_s28  ;;  %s255_s15 = sshll.u32 %s253_s11, 4  ;;  %s256_s15 = int_to_ptr.hbm [resolvable:$true] %s255_s15 }
  0x23   : > { %s257_s14 = sshll.u32 %s248_s10, 4  ;;  %s245_s16 = scalar_lea.sflag [#allocation6], %s221_s9  ;;  %s258_s14 = int_to_ptr.vmem [resolvable:$true] %s257_s14 }
  0x24   : > { %787 = dma.hbm_to_vmem [thread:$0]  (!%p1215_p0), %s256_s15, 128, %s258_s14, %s245_s16  }
  0x25   : > { %266 = sbr.rel (%p263_p3) target bundleno = 130 (0x82), region = 28  ;;  %s1233_s25 = sand.u32 (!%p263_p3), 1, %s1088_s19  }
  0x26   : > { %s1236_s26 = smul.u32 (!%p263_p3), 24, %s1233_s25  ;;  %s269_s20 = scalar_lea.sflag (!%p263_p3), [#allocation3], %s1233_s25 }
  0x28   : > { %s272_s7 = scalar_lea.vmem (!%p263_p3), [#allocation2], %s1236_s26 }
  0x2a   : > { %1063 = dma.done.wait (%p1192_p8), %s269_s20, 384  }
  0x2b   : > { %1065 = vsyncadd (%p1192_p8), %s269_s20, 4294966912  ;;  %s737_s9 = sshll.u32 %s1233_s25, 3  ;;  %s279_s12 = scalar_lea.sflag [#allocation6], %s1233_s25 }
  0x2c   : > { %s282_s17 = scalar_lea.vmem [#allocation5], %s737_s9 }
  0x2d   : > { %1067 = dma.done.wait (%p1192_p8), %s279_s12, 128  }
  0x2e   : > { %1069 = vsyncadd (%p1192_p8), %s279_s12, 4294967168  ;;  %v344_v0 = vld [vmem:[%s272_s7] sm:$0xff]  ;;  %v739_v1 = vld [vmem:[%s272_s7 + $0x8] sm:$0xff]  ;;  %v1108_v12 = vmov 0.0   ;;  %s1259_s30 = scalar_lea.vmem [#allocation10], %s1236_s26  ;;  %s760_s27 = sshll.u32 %s1096_s21, 3 }
  0x2f   : > { %v740_v2 = vld [vmem:[%s272_s7 + $0x10] sm:$0xff]  ;;  %v350_v3 = vmax.f32 %v344_v0, %v739_v1  ;;  %s524_s13 = scalar_lea.hbm %s1411_s5, %s760_s27  ;;  %s329_s11 = scalar_lea.vmem [#allocation11], %s737_s9 }
  0x30   : > { %v349_v5 = vld [vmem:[%s282_s17] sm:$0xff]  ;;  %s526_s10 = sshll.u32 %s329_s11, 4  ;;  %s528_s14 = sshll.u32 %s524_s13, 4  ;;  %s527_s10 = int_to_ptr.vmem [resolvable:$true] %s526_s10  ;;  %s529_s14 = int_to_ptr.hbm [resolvable:$true] %s528_s14 }
  0x31   : > { %v351_v4 = vmax.f32 %v350_v3, %v740_v2  ;;  %vm380_vm0 = vcmp.eq.s32.totalorder %v349_v5, 0  ;;  %vm383_vm1 = vcmp.eq.s32.totalorder %v349_v5, 1  ;;  %vm386_vm2 = vcmp.eq.s32.totalorder %v349_v5, 2  ;;  %s452_s15 = sand.u32 1, %s1172_s24   ;;  %s1278_s16 = smul.u32 24, %s1096_s21 }
  0x32   : > { %v1252_v13 = vsel %vm380_vm0, 1.0, %v1108_v12  ;;  %v1254_v14 = vsel %vm383_vm1, 1.0, %v1108_v12  ;;  %v1256_v15 = vsel %vm386_vm2, 1.0, %v1108_v12  ;;  %s463_s20 = scalar_lea.sflag [#allocation12], %s1233_s25  ;;  %s940_s7 = sshra.s32 %s529_s14, 4  ;;  %s941_s7 = int_to_ptr.hbm [resolvable:$true] %s940_s7 }
  0x33   : > { %v352_v6 = vsub.f32 %v344_v0, %v351_v4  ;;  %v355_v7 = vsub.f32 %v739_v1, %v351_v4  ;;  %v358_v8 = vsub.f32 %v740_v2, %v351_v4  ;;  %410 = vst [vmem:[%s1259_s30] sm:$0xff] %v1252_v13  ;;  %v389_v21 = vmul.f32 %v1252_v13, %v344_v0  ;;  %s942_s9 = scalar_lea.hbm %s941_s7, 8  ;;  %s946_s21 = scalar_lea.hbm %s1411_s5, 16 }
  0x34   : > { %749 = vst [vmem:[%s1259_s30 + $0x8] sm:$0xff] %v1254_v14  ;;  %v390_v22 = vmul.f32 %v1254_v14, %v739_v1  ;;  %v392_v24 = vmul.f32 %v1256_v15, %v740_v2  ;;  %p943_p4 = scmp.ne.s32.totalorder %s941_s7, %s942_s9  ;;  %p947_p7 = scmp.lt.s32.totalorder %s941_s7, %s1411_s5 }
  0x35   : > { %v353_v9 = vmul.f32 1.442695, %v352_v6  ;;  %v356_v10 = vmul.f32 1.442695, %v355_v7  ;;  %v359_v11 = vmul.f32 1.442695, %v358_v8  ;;  %p948_p8 = scmp.lt.s32.totalorder %s946_s21, %s942_s9 }
  0x36   : > { %755 = vst [vmem:[%s1259_s30 + $0x10] sm:$0xff] %v1256_v15  ;;  %v391_v23 = vadd.f32 %v390_v22, %v389_v21  ;;  %p944_p5 = pnand %p943_p4, %p1196_p9 }
  0x37   : > { %856 = vpow2.f32 %v353_v9  ;;  %p949_p10 = por %p948_p8, %p947_p7 }
  0x38   : > { %858 = vpow2.f32 %v356_v10  ;;  %v393_v29 = vadd.f32 %v392_v24, %v391_v23  ;;  %p945_p6 = pneg %p944_p5 }
  0x39   : > { %860 = vpow2.f32 %v359_v11 }
  0x3a   : > { %p950_p13 = pnand %p949_p10, %p945_p6 }
  0x3d   : > { %v857_v16 = vpop.eup %856 }
  0x3e   : > { %v859_v17 = vpop.eup %858 }
  0x3f   : > { %v861_v18 = vpop.eup %860  ;;  %v361_v19 = vadd.f32 %v859_v17, %v857_v16 }
  0x41   : > { %v362_v20 = vadd.f32 %v861_v18, %v361_v19 }
  0x43   : > { %862 = vrcp.f32 %v362_v20  ;;  %v374_v28 = vand.u32 2147483648, %v362_v20  ;;  %vm368_vm3 = vweird.f32 %v362_v20  ;;  %v372_v32 = vand.u32 2147483647, %v362_v20 }
  0x44   : > { %864 = vlog2.f32 %v362_v20 }
  0x45   : > { %v375_v35 = vor.u32 1.1754944e-38, %v374_v28  ;;  %vm373_vm6 = vcmp.eq.f32.partialorder %v372_v32, 8.507059e+37 }
  0x49   : > { %v863_v25 = vpop.eup %862 }
  0x4a   : > { %v865_v26 = vpop.eup %864  ;;  %v364_v27 = vmul.f32 %v863_v25, %v362_v20  ;;  %vm369_vm4 = vweird.f32 %v863_v25 }
  0x4b   : > { %v395_v30 = vmul.f32 0.6931472, %v865_v26  ;;  %vm370_vm5 = vmor %vm368_vm3, %vm369_vm4 }
  0x4c   : > { %v365_v31 = vsub.f32 1.0, %v364_v27 }
  0x4d   : > { %v396_v33 = vadd.f32 %v395_v30, %v351_v4 }
  0x4e   : > { %v366_v34 = vmul.f32 %v863_v25, %v365_v31 }
  0x4f   : > { %v397_v36 = vsub.f32 %v396_v33, %v393_v29 }
  0x50   : > { %v367_v37 = vadd.f32 %v863_v25, %v366_v34 }
  0x51   : > { %446 = vst [vmem:[%s329_s11] sm:$0xff] %v397_v36 }
  0x52   : > { %v371_v38 = vsel %vm370_vm5, %v863_v25, %v367_v37 }
  0x53   : > { %v376_v39 = vsel %vm373_vm6, %v375_v35, %v371_v38 }
  0x54   : > { %v377_v40 = vmul.f32 %v857_v16, %v376_v39  ;;  %v378_v41 = vmul.f32 %v859_v17, %v376_v39  ;;  %v379_v42 = vmul.f32 %v861_v18, %v376_v39 }
  0x55   : > { %953 = shalt.err (!%p950_p13)
}
  0x56   : > { %776 = dma.vmem_to_hbm [thread:$0]  (%p1196_p9), %s527_s10, 128, %s529_s14, %s463_s20   ;;  %v399_v43 = vmul.f32 %v1252_v13, %v377_v40  ;;  %v413_v44 = vmul.f32 %v1254_v14, %v378_v41  ;;  %v429_v45 = vmul.f32 %v1256_v15, %v379_v42 }
  0x57   : > { %s491_s11 = scalar_lea.hbm %s1409_s3, %s1278_s16  ;;  %s315_s12 = scalar_lea.vmem [#allocation8], %s1236_s26 }
  0x58   : > { %s492_s17 = sshll.u32 %s315_s12, 4  ;;  %s474_s21 = scalar_lea.hbm %s1408_s2, %s1278_s16  ;;  %406 = vst [vmem:[%s315_s12] sm:$0xff] %v377_v40  ;;  %s1307_s17 = int_to_ptr.vmem [resolvable:$true] %s492_s17 }
  0x59   : > { %s508_s10 = scalar_lea.hbm %s1410_s4, %s1278_s16  ;;  %s1309_s14 = sshll.u32 %s491_s11, 4  ;;  %747 = vst [vmem:[%s315_s12 + $0x8] sm:$0xff] %v378_v41  ;;  %s495_s14 = int_to_ptr.hbm [resolvable:$true] %s1309_s14 }
  0x5a   : > { %s308_s20 = scalar_lea.vmem [#allocation7], %s1236_s26  ;;  %s1312_s13 = sshll.u32 %s474_s21, 4  ;;  %753 = vst [vmem:[%s315_s12 + $0x10] sm:$0xff] %v379_v42  ;;  %s478_s13 = int_to_ptr.hbm [resolvable:$true] %s1312_s13 }
  0x5b   : > { %s475_s28 = sshll.u32 %s308_s20, 4  ;;  %s509_s7 = sshll.u32 %s1259_s30, 4  ;;  %402 = vst [vmem:[%s308_s20] sm:$0xff] %v399_v43  ;;  %s1318_s28 = int_to_ptr.vmem [resolvable:$true] %s475_s28  ;;  %s1321_s7 = int_to_ptr.vmem [resolvable:$true] %s509_s7 }
  0x5c   : > { %s1315_s9 = sshll.u32 %s508_s10, 4  ;;  %745 = vst [vmem:[%s308_s20 + $0x8] sm:$0xff] %v413_v44  ;;  %s1326_s26 = scalar_lea.sflag [#allocation9], %s452_s15  ;;  %s512_s9 = int_to_ptr.hbm [resolvable:$true] %s1315_s9 }
  0x5d   : > { %751 = vst [vmem:[%s308_s20 + $0x10] sm:$0xff] %v429_v45  ;;  %s968_s16 = sshra.s32 %s495_s14, 4  ;;  %s974_s21 = scalar_lea.hbm %s1409_s3, 48  ;;  %s969_s16 = int_to_ptr.hbm [resolvable:$true] %s968_s16 }
  0x5e   : > { %s970_s11 = scalar_lea.hbm %s969_s16, 24  ;;  %p975_p3 = scmp.lt.s32.totalorder %s969_s16, %s1409_s3 }
  0x5f   : > { %p971_p0 = scmp.ne.s32.totalorder %s969_s16, %s970_s11  ;;  %p976_p4 = scmp.lt.s32.totalorder %s974_s21, %s970_s11 }
  0x61   : > { %p972_p1 = pnand %p971_p0, %p1196_p9  ;;  %p977_p5 = por %p976_p4, %p975_p3 }
  0x63   : > { %p973_p2 = pneg %p972_p1 }
  0x65   : > { %p978_p6 = pnand %p977_p5, %p973_p2 }
  0x67   : > { %981 = shalt.err (!%p978_p6)
}
  0x68   : > { %s1109_s24 = smov 128   ;;  %s1110_s15 = smov 8  }
  0x69   : > { %774 = dma.vmem_to_hbm [thread:$0]  (%p1196_p9), %s1307_s17, 384, %s495_s14, %s1326_s26, %s1109_s24, %s1109_s24, %s1110_s15  }
  0x6a   : > { %s448_s10 = scalar_lea.sflag [#allocation4], %s1233_s25  ;;  %s996_s20 = sshra.s32 %s478_s13, 4  ;;  %s997_s20 = int_to_ptr.hbm [resolvable:$true] %s996_s20 }
  0x6b   : > { %s998_s16 = scalar_lea.hbm %s997_s20, 24  ;;  %s1002_s12 = scalar_lea.hbm %s1408_s2, 48 }
  0x6c   : > { %p999_p7 = scmp.ne.s32.totalorder %s997_s20, %s998_s16  ;;  %p1003_p13 = scmp.lt.s32.totalorder %s997_s20, %s1408_s2 }
  0x6d   : > { %p1004_p0 = scmp.lt.s32.totalorder %s1002_s12, %s998_s16 }
  0x6e   : > { %p1000_p8 = pnand %p999_p7, %p1196_p9 }
  0x6f   : > { %p1005_p1 = por %p1004_p0, %p1003_p13 }
  0x70   : > { %p1001_p10 = pneg %p1000_p8 }
  0x72   : > { %p1006_p2 = pnand %p1005_p1, %p1001_p10 }
  0x74   : > { %1009 = shalt.err (!%p1006_p2)
}
  0x75   : > { %773 = dma.vmem_to_hbm [thread:$0]  (%p1196_p9), %s1318_s28, 384, %s478_s13, %s448_s10, %s1109_s24, %s1109_s24, %s1110_s15  }
  0x76   : > { %s1024_s25 = sshra.s32 %s512_s9, 4  ;;  %s1030_s20 = scalar_lea.hbm %s1410_s4, 48  ;;  %s1025_s25 = int_to_ptr.hbm [resolvable:$true] %s1024_s25 }
  0x77   : > { %s1026_s17 = scalar_lea.hbm %s1025_s25, 24  ;;  %p1031_p6 = scmp.lt.s32.totalorder %s1025_s25, %s1410_s4 }
  0x78   : > { %p1027_p3 = scmp.ne.s32.totalorder %s1025_s25, %s1026_s17  ;;  %p1032_p7 = scmp.lt.s32.totalorder %s1030_s20, %s1026_s17 }
  0x7a   : > { %p1028_p4 = pnand %p1027_p3, %p1196_p9  ;;  %p1033_p8 = por %p1032_p7, %p1031_p6 }
  0x7c   : > { %p1029_p5 = pneg %p1028_p4 }
  0x7e   : > { %p1034_p10 = pnand %p1033_p8, %p1029_p5 }
  0x80   : > { %1037 = shalt.err (!%p1034_p10)
}
  0x81   : > { %775 = dma.vmem_to_hbm [thread:$0]  (%p1196_p9), %s1321_s7, 384, %s512_s9, %s1326_s26, %s1109_s24, %s1109_s24, %s1110_s15  }
  0x82 PF: > { %s540_s28 = sand.u32 1, %s1084_s18   ;;  %p789_p13 = pnand %p732_p12, %p1205_p11 }
  0x83   : > { %s541_s13 = scalar_lea.sflag [#allocation4], %s540_s28 }
  0x84   : > { %p790_p0 = pneg %p789_p13 }
  0x86   : > { %1071 = dma.done.wait (%p790_p0), %s541_s13, 384  }
  0x87   : > { %1073 = vsyncadd (%p790_p0), %s541_s13, 4294966912  ;;  %s1423_s6 = sadd.s32 4294967294, %s1104_s23  }
  0x88   : > { %s550_s10 = sand.u32 1, %s1423_s6  }
  0x89   : > { %s551_s30 = scalar_lea.sflag [#allocation9], %s550_s10 }
  0x8a   : > { %1075 = dma.done.wait (%p790_p0), %s551_s30, 768  }
  0x8b   : > { %1077 = vsyncadd (%p790_p0), %s551_s30, 4294966528  ;;  %s571_s12 = scalar_lea.sflag [#allocation12], %s540_s28 }
  0x8c   : > { %1079 = dma.done.wait (%p790_p0), %s571_s12, 128  }
  0x8d   : > { %1081 = vsyncadd (%p790_p0), %s571_s12, 4294967168  ;;  %s31_s23 = sadd.s32 1, %s1104_s23   ;;  %s1424_s8 = sld [smem:[#allocation18_spill]] }
  0x8e   : > { %p28_p9 = scmp.ge.s32.totalorder %s31_s23, 4   ;;  %s1425_s20 = sld [smem:[#allocation20_spill]] }
  0x8f   : > { %s1426_s7 = sld [smem:[#allocation19_spill]]  ;;  %s1427_s18 = smov %s1088_s19 }
  0x90   : > { %s1429_s21 = smov %s1100_s22 }
  0x91   :  { %30 = sbr.rel (!%p28_p9) target bundleno = 12 (0xc), region = 147 }
  0x93   : > { %s1428_s19 = smov %s1424_s8 }
  0x95   : > { %s1430_s22 = smov %s1426_s7 }
  0x96   :  { %577 = vsyncpa [#allocation3], 1 }
  0x97   :  { %579 = vsyncpa [#allocation3 + $0x1], 1 }
  0x98   :  { %580 = vsyncpa [#allocation6], 1 }
  0x99   :  { %582 = vsyncpa [#allocation6 + $0x1], 1 }
  0x9a   :  { %583 = vsyncpa [#allocation4], 1 }
  0x9b   :  { %585 = vsyncpa [#allocation4 + $0x1], 1 }
  0x9c   :  { %586 = vsyncpa [#allocation9], 1 }
  0x9d   :  { %588 = vsyncpa [#allocation9 + $0x1], 1 }
  0x9e   :  { %589 = vsyncpa [#allocation12], 1 }
  0x9f   :  { %591 = vsyncpa [#allocation12 + $0x1], 1 }

</bundles_post_ra>
